<compile_context>
chip_gen: v7x
topology: tpu7x:2x2x1
jax: 0.10.0
libtpu: 0.0.40
codegen_flags: <defaults>
</compile_context>

<pallas_src>
import numpy as np
import jax
import jax.numpy as jnp
from jax.experimental import pallas as pl
from jax.experimental.pallas import tpu as pltpu


def gaussian_kernel_1d(ksize: int, sigma: float) -> np.ndarray:
    """Same formula as cv2.getGaussianKernel(ksize, sigma) for sigma > 0."""
    i = np.arange(ksize, dtype=np.float64)
    g = np.exp(-((i - (ksize - 1) / 2.0) ** 2) / (2.0 * sigma * sigma))
    return (g / g.sum()).astype(np.float32)


def replication_blur_matrix(n: int, g1d: np.ndarray) -> np.ndarray:
    """[n, n] band matrix T with T @ x == 1-D Gaussian cross-correlation of x
    with replication ("edge") padding of width K//2 folded into the edge rows."""
    K = len(g1d)
    p = K // 2
    T = np.zeros((n, n), dtype=np.float64)
    for i in range(n):
        for d in range(K):
            j = min(max(i + d - p, 0), n - 1)
            T[i, j] += float(g1d[d])
    return T.astype(np.float32)


def hfc_filter(x, mask, *, filter_width, nsig, ratio, sub_low_ratio,
               is_clamp=True, sub_mask=True, max_lanes=512):
    """Pallas implementation of HFCFilter.forward(x, mask).

    x:    [B, C, H, W] float32
    mask: [B, 1, H, W] float32 (broadcast over channels, as in PyTorch)
    """
    B, C, H, W = x.shape
    N = H * W
    K = int(filter_width)
    assert K % 2 == 1, "filter_width must be odd for shapes to match (as in PyTorch)"

    g1d = gaussian_kernel_1d(K, float(nsig))

    # --- channel packing: largest divisor of C with C_blk*W <= max_lanes ----
    c_blk = 1
    for cb in range(1, C + 1):
        if C % cb == 0 and cb * W <= max(max_lanes, W):
            c_blk = cb
    G = C // c_blk
    Lp = c_blk * W

    # --- banded Toeplitz blur matrices (replication padding folded in) ------
    V = jnp.asarray(replication_blur_matrix(H, g1d))                 # [H, H]
    Wt = replication_blur_matrix(W, g1d).T                           # [W, W]
    WtB = jnp.asarray(np.kron(np.eye(c_blk, dtype=np.float32), Wt))  # [Lp, Lp]

    # --- lower median per (b, c) plane (torch.median semantics), + 0.2 ------
    med = jnp.sort(x.reshape(B, C, N), axis=-1)[..., (N - 1) // 2] + 0.2     # [B, C]
    med_row = jnp.repeat(med.reshape(B, G, c_blk), W, axis=-1)               # [B, G, Lp]
    med_row = med_row.reshape(B, G, 1, Lp)

    # --- pack channels along lanes: [B, C, H, W] -> [B, G, H, c_blk*W] ------
    x_p = x.reshape(B, G, c_blk, H, W).transpose(0, 1, 3, 2, 4).reshape(B, G, H, Lp)

    ratio_f = float(ratio)
    slr_f = float(sub_low_ratio)

    def kernel(x_ref, m_ref, med_ref, v_ref, wt_ref, o_ref):
        xp = x_ref[...]                        # [H, Lp]
        m = m_ref[...]                         # [H, W] (shared across channels)
        if c_blk > 1:
            m = jnp.concatenate([m] * c_blk, axis=1)   # tile over packed channels -> [H, Lp]
        med_r = med_ref[...]                   # [1, Lp], already + 0.2

        # median padding: mask*x + (1-mask)*(median + 0.2)
        xm = m * xp + (1.0 - m) * med_r

        # Gaussian blur with replication padding: V @ xm @ block_diag(Wt) on the MXU
        tmp = jnp.dot(v_ref[...], xm, preferred_element_type=jnp.float32)    # [H, Lp]
        blur = jnp.dot(tmp, wt_ref[...], preferred_element_type=jnp.float32) # [H, Lp]

        # high-frequency component + clamp + mask
        res = ratio_f * (xm - slr_f * blur)
        if is_clamp:
            res = jnp.clip(res, -1.0, 1.0)
        if sub_mask:
            res = (res + 1.0) * m - 1.0
        o_ref[...] = res.astype(o_ref.dtype)

    # VMEM budget (explicit; v5e scoped default is only 16 MiB, v7x physical 64 MiB)
    block_bytes = 4 * (2 * H * Lp + H * W + Lp + H * H + Lp * Lp)
    vmem_limit = int(min(32 * 1024 * 1024, max(2 * 1024 * 1024, 4 * block_bytes)))

    flops = B * G * (2 * H * H * Lp + 2 * H * Lp * Lp + 10 * H * Lp)
    bytes_accessed = 4 * (2 * x.size + mask.size + B * G * Lp + H * H + Lp * Lp)

    out_p = pl.pallas_call(
        kernel,
        out_shape=jax.ShapeDtypeStruct((B, G, H, Lp), x.dtype),
        grid=(B, G),
        in_specs=[
            pl.BlockSpec((None, None, H, Lp), lambda b, g: (b, g, 0, 0)),  # packed x slab
            pl.BlockSpec((None, None, H, W), lambda b, g: (b, 0, 0, 0)),   # mask (shared over C)
            pl.BlockSpec((None, None, 1, Lp), lambda b, g: (b, g, 0, 0)),  # medians (+0.2), per channel
            pl.BlockSpec((H, H), lambda b, g: (0, 0)),                     # vertical band matrix
            pl.BlockSpec((Lp, Lp), lambda b, g: (0, 0)),                   # horizontal band matrix
        ],
        out_specs=pl.BlockSpec((None, None, H, Lp), lambda b, g: (b, g, 0, 0)),
        compiler_params=pltpu.CompilerParams(
            dimension_semantics=("parallel", "parallel"),
            vmem_limit_bytes=vmem_limit),
        cost_estimate=pl.CostEstimate(flops=int(flops), transcendentals=0,
                                      bytes_accessed=int(bytes_accessed)),
    )(x_p, mask, med_row, V, WtB)

    # unpack [B, G, H, c_blk*W] -> [B, C, H, W]
    out = out_p.reshape(B, G, H, c_blk, W).transpose(0, 1, 3, 2, 4).reshape(B, C, H, W)
    return out


def hfc_reference(x, mask, kern2d, ratio, sub_low_ratio):
    """Pure-JAX reference mirroring the PyTorch module (elementwise tap conv,
    no MXU, so it is numerically unambiguous)."""
    B, C, H, W = x.shape
    N = H * W
    med = jnp.sort(x.reshape(B, C, N), axis=-1)[..., (N - 1) // 2][:, :, None, None] + 0.2
    xm = mask * x + (1.0 - mask) * med
    K = kern2d.shape[0]
    p = K // 2
    xpad = jnp.pad(xm, ((0, 0), (0, 0), (p, p), (p, p)), mode="edge")
    g = jnp.zeros_like(xm)
    for dy in range(K):
        for dx in range(K):
            g = g + float(kern2d[dy, dx]) * xpad[:, :, dy:dy + H, dx:dx + W]
    res = ratio * (xm - sub_low_ratio * g)
    res = jnp.clip(res, -1.0, 1.0)
    res = (res + 1.0) * mask - 1.0
    return res


if __name__ == "__main__":
    # Synthetic config (filter_width must be odd for PyTorch shapes to line up).
    filter_width = 5
    nsig = 3.0
    ratio = 4.0
    sub_low_ratio = 1.0

    B, C, H, W = 2, 4, 16, 16
    key = jax.random.PRNGKey(0)
    k1, k2 = jax.random.split(key)
    x = jax.random.uniform(k1, (B, C, H, W), jnp.float32, minval=-1.0, maxval=1.0)
    mask = (jax.random.uniform(k2, (B, 1, H, W)) > 0.3).astype(jnp.float32)

    out = hfc_filter(x, mask, filter_width=filter_width, nsig=nsig,
                     ratio=ratio, sub_low_ratio=sub_low_ratio)
    out = jax.block_until_ready(out)

    g1d = gaussian_kernel_1d(filter_width, nsig)
    kern2d = np.outer(g1d, g1d).astype(np.float32)
    ref = hfc_reference(x, mask, kern2d, ratio, sub_low_ratio)

    assert out.shape == (B, C, H, W)
    max_err = float(jnp.max(jnp.abs(out - ref)))
    # Margin covers possible reduced-precision MXU passes for f32 operands on
    # some generations; the Mosaic f32 matmul path typically lands ~1e-6 here,
    # while any structural bug (bad band matrix / packing) would be >1e-1.
    assert max_err < 2e-2, f"mismatch vs reference: {max_err}"
    print("KERNEL_OK")
</pallas_src>

<mosaic_0001>
module attributes {stable_mosaic.version = 11 : i64} {
  func.func @kernel(%arg0: i32, %arg1: i32, %arg2: memref<1x1x16x64xf32, #tpu.memory_space<vmem>>, %arg3: memref<1x1x16x16xf32, #tpu.memory_space<vmem>>, %arg4: memref<1x1x1x64xf32, #tpu.memory_space<vmem>>, %arg5: memref<16x16xf32, #tpu.memory_space<vmem>>, %arg6: memref<64x64xf32, #tpu.memory_space<vmem>>, %arg7: memref<1x1x16x64xf32, #tpu.memory_space<vmem>>) attributes {dimension_semantics = [#tpu.dimension_semantics<parallel>, #tpu.dimension_semantics<parallel>], iteration_bounds = array<i64: 2, 1>, scalar_prefetch = 0 : i64, scratch_operands = 0 : i64, tpu.core_type = #tpu.core_type<tc>, window_params = [{transform_indices = @transform_0, window_bounds = array<i64: 1, 1, 16, 64>}, {transform_indices = @transform_1, window_bounds = array<i64: 1, 1, 16, 16>}, {transform_indices = @transform_2, window_bounds = array<i64: 1, 1, 1, 64>}, {pipeline_mode = #tpu.pipeline_mode<synchronous>, transform_indices = @transform_3, window_bounds = array<i64: 16, 16>}, {pipeline_mode = #tpu.pipeline_mode<synchronous>, transform_indices = @transform_4, window_bounds = array<i64: 64, 64>}, {transform_indices = @transform_5, window_bounds = array<i64: 1, 1, 16, 64>}]} {
    %c0 = arith.constant 0 : index
    %c0_0 = arith.constant 0 : index
    %c0_1 = arith.constant 0 : index
    %c0_2 = arith.constant 0 : index
    %0 = vector.load %arg2[%c0, %c0_0, %c0_1, %c0_2] : memref<1x1x16x64xf32, #tpu.memory_space<vmem>>, vector<1x1x16x64xf32>
    %1 = vector.shape_cast %0 : vector<1x1x16x64xf32> to vector<16x64xf32>
    %c0_3 = arith.constant 0 : index
    %c0_4 = arith.constant 0 : index
    %c0_5 = arith.constant 0 : index
    %c0_6 = arith.constant 0 : index
    %2 = vector.load %arg3[%c0_3, %c0_4, %c0_5, %c0_6] : memref<1x1x16x16xf32, #tpu.memory_space<vmem>>, vector<1x1x16x16xf32>
    %3 = vector.shape_cast %2 : vector<1x1x16x16xf32> to vector<16x16xf32>
    %4 = tpu.concatenate %3, %3, %3, %3 in 1 : vector<16x16xf32>, vector<16x16xf32>, vector<16x16xf32>, vector<16x16xf32> -> vector<16x64xf32>
    %c0_7 = arith.constant 0 : index
    %c0_8 = arith.constant 0 : index
    %c0_9 = arith.constant 0 : index
    %c0_10 = arith.constant 0 : index
    %5 = vector.load %arg4[%c0_7, %c0_8, %c0_9, %c0_10] : memref<1x1x1x64xf32, #tpu.memory_space<vmem>>, vector<1x1x1x64xf32>
    %6 = vector.shape_cast %5 : vector<1x1x1x64xf32> to vector<1x64xf32>
    %7 = arith.mulf %4, %1 : vector<16x64xf32>
    %cst = arith.constant 1.000000e+00 : f32
    %8 = vector.broadcast %cst : f32 to vector<16x64xf32>
    %9 = arith.subf %8, %4 : vector<16x64xf32>
    %10 = vector.broadcast %6 : vector<1x64xf32> to vector<16x64xf32>
    %11 = arith.mulf %9, %10 : vector<16x64xf32>
    %12 = arith.addf %7, %11 : vector<16x64xf32>
    %c0_11 = arith.constant 0 : index
    %c0_12 = arith.constant 0 : index
    %13 = vector.load %arg5[%c0_11, %c0_12] : memref<16x16xf32, #tpu.memory_space<vmem>>, vector<16x16xf32>
    %cst_13 = arith.constant dense<0.000000e+00> : vector<16x64xf32>
    %14 = tpu.matmul %13, %12, %cst_13 {dimension_numbers = #tpu.dot_dimension_numbers<[1], [0], [0], [1], [0, 0, 1, 1], [], []>} : vector<16x16xf32>, vector<16x64xf32>, vector<16x64xf32> -> vector<16x64xf32>
    %c0_14 = arith.constant 0 : index
    %c0_15 = arith.constant 0 : index
    %15 = vector.load %arg6[%c0_14, %c0_15] : memref<64x64xf32, #tpu.memory_space<vmem>>, vector<64x64xf32>
    %cst_16 = arith.constant dense<0.000000e+00> : vector<16x64xf32>
    %16 = tpu.matmul %14, %15, %cst_16 {dimension_numbers = #tpu.dot_dimension_numbers<[1], [0], [0], [1], [0, 0, 1, 1], [], []>} : vector<16x64xf32>, vector<64x64xf32>, vector<16x64xf32> -> vector<16x64xf32>
    %cst_17 = arith.constant 1.000000e+00 : f32
    %17 = vector.broadcast %cst_17 : f32 to vector<16x64xf32>
    %18 = arith.mulf %17, %16 : vector<16x64xf32>
    %19 = arith.subf %12, %18 : vector<16x64xf32>
    %cst_18 = arith.constant 4.000000e+00 : f32
    %20 = vector.broadcast %cst_18 : f32 to vector<16x64xf32>
    %21 = arith.mulf %20, %19 : vector<16x64xf32>
    %cst_19 = arith.constant -1.000000e+00 : f32
    %cst_20 = arith.constant 1.000000e+00 : f32
    %22 = vector.broadcast %cst_19 : f32 to vector<16x64xf32>
    %23 = arith.maximumf %22, %21 : vector<16x64xf32>
    %24 = vector.broadcast %cst_20 : f32 to vector<16x64xf32>
    %25 = arith.minimumf %24, %23 : vector<16x64xf32>
    %cst_21 = arith.constant 1.000000e+00 : f32
    %26 = vector.broadcast %cst_21 : f32 to vector<16x64xf32>
    %27 = arith.addf %25, %26 : vector<16x64xf32>
    %28 = arith.mulf %27, %4 : vector<16x64xf32>
    %cst_22 = arith.constant 1.000000e+00 : f32
    %29 = vector.broadcast %cst_22 : f32 to vector<16x64xf32>
    %30 = arith.subf %28, %29 : vector<16x64xf32>
    %c0_23 = arith.constant 0 : index
    %c0_24 = arith.constant 0 : index
    %c0_25 = arith.constant 0 : index
    %c0_26 = arith.constant 0 : index
    %31 = vector.load %arg7[%c0_23, %c0_24, %c0_25, %c0_26] : memref<1x1x16x64xf32, #tpu.memory_space<vmem>>, vector<1x1x16x64xf32>
    %32 = vector.shape_cast %31 : vector<1x1x16x64xf32> to vector<16x64xf32>
    %33 = vector.shape_cast %30 : vector<16x64xf32> to vector<1x1x16x64xf32>
    tpu.vector_store %arg7[%c0_23, %c0_24, %c0_25, %c0_26], %33 {strides = array<i32>} : memref<1x1x16x64xf32, #tpu.memory_space<vmem>>, vector<1x1x16x64xf32>,
    return
  }
  func.func @transform_0(%arg0: i32, %arg1: i32) -> (i32, i32, i32, i32) {
    %c0_i32 = arith.constant 0 : i32
    %c0_i32_0 = arith.constant 0 : i32
    %c0_i32_1 = arith.constant 0 : i32
    return %arg0, %arg1, %c0_i32, %c0_i32_0 : i32, i32, i32, i32
  }
  func.func @transform_1(%arg0: i32, %arg1: i32) -> (i32, i32, i32, i32) {
    %c0_i32 = arith.constant 0 : i32
    %c0_i32_0 = arith.constant 0 : i32
    %c0_i32_1 = arith.constant 0 : i32
    %c0_i32_2 = arith.constant 0 : i32
    return %arg0, %c0_i32, %c0_i32_0, %c0_i32_1 : i32, i32, i32, i32
  }
  func.func @transform_2(%arg0: i32, %arg1: i32) -> (i32, i32, i32, i32) {
    %c0_i32 = arith.constant 0 : i32
    %c0_i32_0 = arith.constant 0 : i32
    %c0_i32_1 = arith.constant 0 : i32
    return %arg0, %arg1, %c0_i32, %c0_i32_0 : i32, i32, i32, i32
  }
  func.func @transform_3(%arg0: i32, %arg1: i32) -> (i32, i32) {
    %c0_i32 = arith.constant 0 : i32
    %c0_i32_0 = arith.constant 0 : i32
    %c0_i32_1 = arith.constant 0 : i32
    return %c0_i32, %c0_i32_0 : i32, i32
  }
  func.func @transform_4(%arg0: i32, %arg1: i32) -> (i32, i32) {
    %c0_i32 = arith.constant 0 : i32
    %c0_i32_0 = arith.constant 0 : i32
    %c0_i32_1 = arith.constant 0 : i32
    return %c0_i32, %c0_i32_0 : i32, i32
  }
  func.func @transform_5(%arg0: i32, %arg1: i32) -> (i32, i32, i32, i32) {
    %c0_i32 = arith.constant 0 : i32
    %c0_i32_0 = arith.constant 0 : i32
    %c0_i32_1 = arith.constant 0 : i32
    return %arg0, %arg1, %c0_i32, %c0_i32_0 : i32, i32, i32, i32
  }
}

</mosaic_0001>

<bundles_post_ra>
// kernel: tpu_custom_call.1
= control target key start
LH: loop header
LB: loop body
LE: loop exit
PB: predicated region body
PF: predicated region fallthrough
CT: control target
= control target key end

     0   :  { %s1525_s0 = inlined_call_operand.hbm [shape: f32[2,1,16,64], index: 0, kind: input, shape index: {}]   ;;  %s1526_s1 = inlined_call_operand.hbm [shape: f32[2,1,16,16], index: 1, kind: input, shape index: {}]   ;;  %s1527_s2 = inlined_call_operand.vmem [shape: f32[2,1,1,64], index: 2, kind: input, shape index: {}]   ;;  %s1528_s3 = inlined_call_operand.hbm [shape: f32[16,16], index: 3, kind: input, shape index: {}]   ;;  %s1529_s4 = inlined_call_operand.hbm [shape: f32[64,64], index: 4, kind: input, shape index: {}]   ;;  %s1530_s5 = inlined_call_operand.hbm [shape: f32[2,1,16,64], index: 5, kind: output, shape index: {}]  }
   0x1   :  { %1540 = sst [smem:[#allocation19_spill]] %s1525_s0 }
   0x2   :  { %1541 = sst [smem:[#allocation20_spill]] %s1528_s3 }
   0x3   :  { %1542 = sst [smem:[#allocation21_spill]] %s1529_s4 }
   0x4   :  { %10 = vsyncpa [#allocation3], 0 }
   0x5   :  { %12 = vsyncpa [#allocation3 + $0x1], 0 }
   0x6   :  { %13 = vsyncpa [#allocation6], 0 }
   0x7   :  { %15 = vsyncpa [#allocation6 + $0x1], 0 }
   0x8   :  { %16 = vsyncpa [#allocation9], 0 }
   0x9   :  { %17 = vsyncpa [#allocation4], 0 }
   0xa   :  { %19 = vsyncpa [#allocation4 + $0x1], 0  ;;  %s1193_s18 = smov 0   ;;  %s1195_s19 = smov 0  }
   0xb   :  { %s1197_s20 = smov 0   ;;  %s1199_s21 = smov 0  }
   0xc   :  { %s1201_s22 = smov 0   ;;  %s1203_s23 = smov 0  }
   0xd LB: > { %1543 = sst [smem:[#allocation16_spill]] %s1145_s22  ;;  %s1224_s24 = sadd.s32 4294967295, %s1149_s23   ;;  %s1149_s23 = sphi %s1203_s23, %s25_s23   ;;  %s1145_s22 = sphi %s1201_s22, %s1568_s22   ;;  %s1141_s21 = sphi %s1199_s21, %s1567_s21   ;;  %s1137_s20 = sphi %s1197_s20, %s1571_s20   ;;  %s1133_s19 = sphi %s1195_s19, %s1570_s19   ;;  %s1129_s18 = sphi %s1193_s18, %s1569_s18  }
   0xe   : > { %s750_s25 = sadd.s32 4294967294, %s1149_s23   ;;  %p59_p0 = scmp.ne.s32.totalorder %s1133_s19, %s1129_s18 }
   0xf   : > { %p1531_p1 = scmp.eq.s32.totalorder %s1224_s24, 0  ;;  %p187_p3 = scmp.eq.s32.totalorder %s750_s25, 1 }
  0x10   : > { %p751_p5 = scmp.ge.s32.totalorder %s1149_s23, 1  ;;  %p194_p7 = scmp.lt.s32.totalorder %s1149_s23, 3 }
  0x11   : > { %p1233_p4 = por %p1531_p1, %p59_p0  ;;  %p1238_p6 = por %p187_p3, %p59_p0 }
  0x12   : > { %p1243_p8 = pnand %p751_p5, %p194_p7  ;;  %s1151_s29 = smov [#allocation7]  }
  0x13   : > { %s1544_s26 = scalar_select %p1233_p4, 1, 0 }
  0x14   : > { %s1545_s27 = scalar_select %p1238_p6, 1, 0 }
  0x15   : > { %s206_s30 = sshll.u32 %s1151_s29, 4  ;;  %p858_p9 = pneg %p1243_p8  ;;  %s1247_s30 = int_to_ptr.vmem [resolvable:$true] %s206_s30 }
  0x16   : > { %s1152_s7 = smov [#allocation8]   ;;  %s1548_s3 = sld [smem:[#allocation20_spill]] }
  0x17   : > { %p1254_p11 = pnand %p858_p9, %p1531_p1  ;;  %s219_s8 = sshll.u32 %s1152_s7, 4  ;;  %s1258_s8 = int_to_ptr.vmem [resolvable:$true] %s219_s8 }
  0x19   : > { %p941_p13 = pneg %p1254_p11 }
  0x1c   : > { %s939_s11 = scalar_lea.hbm %s1548_s3, 256 }
  0x1d   : > { %p940_p12 = scmp.ne.s32.totalorder %s1548_s3, %s939_s11  ;;  %p946_p5 = scmp.lt.u32.totalorder %s939_s11, %s1548_s3 }
  0x1f   : > { %p942_p0 = pnand %p941_p13, %p940_p12 }
  0x21   : > { %p943_p3 = pneg %p942_p0 }
  0x23   : > { %p948_p7 = pnand %p946_p5, %p943_p3 }
  0x25   : > { %951 = shalt.err (!%p948_p7)
}
  0x26   : > { %s952_s16 = scalar_lea.vmem %s1247_s30, 256  ;;  %p960_p2 = scmp.lt.s32.totalorder %s1247_s30, %s1247_s30 }
  0x27   : > { %p953_p9 = scmp.ne.s32.totalorder %s1247_s30, %s952_s16  ;;  %p961_p12 = scmp.lt.s32.totalorder %s952_s16, %s952_s16 }
  0x29   : > { %p955_p10 = pnand %p953_p9, %p941_p13  ;;  %p962_p0 = por %p961_p12, %p960_p2 }
  0x2b   : > { %p956_p1 = pneg %p955_p10 }
  0x2d   : > { %p963_p6 = pnand %p962_p0, %p956_p1 }
  0x2f   : > { %966 = shalt.err (!%p963_p6)
}
  0x30   : > { %s1532_s17 = smov 128   ;;  %s1534_s25 = smov 8  }
  0x31   : > { %861 = dma.hbm_to_vmem [thread:$0]  (!%p1254_p11), %s1548_s3, 256, %s1247_s30, [#allocation6], %s1532_s17, %s1532_s17, %s1534_s25  }
  0x32   : > { %s1549_s4 = sld [smem:[#allocation21_spill]] }
  0x38   : > { %s967_s11 = scalar_lea.hbm %s1549_s4, 1024 }
  0x39   : > { %p968_p1 = scmp.ne.s32.totalorder %s1549_s4, %s967_s11  ;;  %p974_p10 = scmp.lt.u32.totalorder %s967_s11, %s1549_s4 }
  0x3b   : > { %p970_p2 = pnand %p968_p1, %p941_p13 }
  0x3d   : > { %p971_p6 = pneg %p970_p2 }
  0x3f   : > { %p976_p3 = pnand %p974_p10, %p971_p6 }
  0x41   : > { %979 = shalt.err (!%p976_p3)
}
  0x42   : > { %s980_s30 = scalar_lea.vmem %s1258_s8, 1024  ;;  %p988_p12 = scmp.lt.s32.totalorder %s1258_s8, %s1258_s8 }
  0x43   : > { %p981_p5 = scmp.ne.s32.totalorder %s1258_s8, %s980_s30  ;;  %p989_p0 = scmp.lt.s32.totalorder %s980_s30, %s980_s30 }
  0x45   : > { %p983_p7 = pnand %p981_p5, %p941_p13  ;;  %p990_p1 = por %p989_p0, %p988_p12 }
  0x47   : > { %p984_p9 = pneg %p983_p7 }
  0x49   : > { %p991_p2 = pnand %p990_p1, %p984_p9 }
  0x4b   : > { %994 = shalt.err (!%p991_p2)
}
  0x4c   : > { %864 = dma.hbm_to_vmem [thread:$0]  (!%p1254_p11), %s1549_s4, 1024, %s1258_s8, [#allocation9], %s1532_s17, %s1532_s17, %s1534_s25  }
  0x4d   : > { %s37_s6 = sadd.s32 1, %s1145_s22  ;;  %s46_s7 = sadd.s32 1, %s1137_s20 }
  0x4e   : > { %p39_p13 = scmp.ge.s32.totalorder %s37_s6, 2  ;;  %p53_p6 = scmp.ne.s32.totalorder %s1137_s20, %s1133_s19 }
  0x4f   : > { %p54_p10 = scmp.eq.s32.totalorder %s1149_s23, 0  ;;  %p878_p3 = scmp.lt.s32.totalorder %s1149_s23, 2 }
  0x50   : > { %s1573_s6 = smov (%p39_p13, %s37_s6), 0  ;;  %p1551_p7 = scmp.eq.s32.totalorder %s1224_s24, 1 }
  0x51   : > { %1550 = sst [smem:[#allocation17_spill]] %s1573_s6  ;;  %p55_p5 = por %p54_p10, %p53_p6 }
  0x52   : > { %p1328_p9 = por %p1551_p7, %p53_p6  ;;  %s41_s10 = ssub.s32 %s1145_s22, %s1573_s6 }
  0x53   : > { %s233_s11 = sand.u32 1, %s1137_s20   ;;  %p44_p12 = scmp.eq.s32.totalorder %s41_s10, 0 }
  0x54   : > { %s1552_s9 = scalar_select %p1328_p9, 1, 0 }
  0x55   : > { %s1335_s8 = sshll.u32 %s233_s11, 4  ;;  %s781_s12 = sshll.u32 %s1145_s22, 8 }
  0x56   : > { %s1339_s13 = scalar_select %p44_p12, %s1137_s20, %s46_s7  }
  0x57   : > { %s1554_s0 = sld [smem:[#allocation19_spill]]  ;;  %s237_s16 = scalar_lea.vmem [#allocation2], %s1335_s8 }
  0x58   : > { %1553 = sst [smem:[#allocation18_spill]] %s1339_s13  ;;  %s246_s29 = sshll.u32 %s237_s16, 4  ;;  %s1353_s29 = int_to_ptr.vmem [resolvable:$true] %s246_s29 }
  0x59   : > { %p1349_p11 = pnand %p878_p3, %p55_p5  ;;  %s1358_s14 = scalar_lea.hbm %s1526_s1, %s781_s12 }
  0x5a   : > { %s1360_s15 = scalar_lea.sflag [#allocation3], %s233_s11 }
  0x5b   : > { %p997_p1 = pneg %p1349_p11 }
  0x5d   : > { %s1344_s30 = scalar_lea.hbm %s1554_s0, %s781_s12  ;;  %s1000_s4 = scalar_lea.hbm %s1554_s0, 512 }
  0x5e   : > { %s995_s25 = scalar_lea.hbm %s1344_s30, 256  ;;  %p1001_p6 = scmp.lt.u32.totalorder %s1344_s30, %s1554_s0 }
  0x5f   : > { %p996_p0 = scmp.ne.s32.totalorder %s1344_s30, %s995_s25  ;;  %p1002_p10 = scmp.lt.u32.totalorder %s1000_s4, %s995_s25 }
  0x60   : > { %p1004_p5 = scmp.lt.u32.totalorder %s995_s25, %s1344_s30 }
  0x61   : > { %p998_p2 = pnand %p997_p1, %p996_p0  ;;  %p1003_p3 = por %p1002_p10, %p1001_p6 }
  0x63   : > { %p999_p13 = pneg %p998_p2  ;;  %p1005_p7 = por %p1004_p5, %p1003_p3 }
  0x65   : > { %p1006_p12 = pnand %p1005_p7, %p999_p13 }
  0x67   : > { %1009 = shalt.err (!%p1006_p12)
}
  0x68   : > { %s1010_s17 = scalar_lea.vmem %s1353_s29, 256  ;;  %s1155_s3 = smov [#allocation2]  }
  0x69   : > { %p1011_p0 = scmp.ne.s32.totalorder %s1353_s29, %s1010_s17  ;;  %s1015_s11 = sshll.u32 %s1155_s3, 4  ;;  %s1016_s11 = int_to_ptr.vmem [resolvable:$false] %s1015_s11 }
  0x6a   : > { %s1017_s22 = scalar_lea.vmem %s1016_s11, 512  ;;  %p1018_p4 = scmp.lt.s32.totalorder %s1353_s29, %s1016_s11 }
  0x6b   : > { %p1013_p2 = pnand %p1011_p0, %p997_p1  ;;  %p1019_p6 = scmp.lt.s32.totalorder %s1017_s22, %s1010_s17 }
  0x6d   : > { %p1014_p9 = pneg %p1013_p2  ;;  %p1020_p10 = por %p1019_p6, %p1018_p4 }
  0x6f   : > { %p1021_p3 = pnand %p1020_p10, %p1014_p9 }
  0x71   : > { %1024 = shalt.err (!%p1021_p3)
}
  0x72   : > { %s1556_s4 = smov 8   ;;  %s1557_s25 = smov 128  }
  0x73   : > { %868 = dma.hbm_to_vmem [thread:$0]  (!%p1349_p11), %s1344_s30, 256, %s1353_s29, %s1360_s15, %s1557_s25, %s1557_s25, %s1556_s4  }
  0x74   : > { %s260_s6 = scalar_lea.vmem [#allocation5], %s1335_s8  ;;  %s256_s7 = sand.u32 1, %s1149_s23  }
  0x75   : > { %s267_s12 = sshll.u32 %s260_s6, 4  ;;  %s1395_s16 = scalar_lea.sflag [#allocation6], %s256_s7  ;;  %s1393_s12 = int_to_ptr.vmem [resolvable:$true] %s267_s12 }
  0x76   : > { %s1025_s17 = scalar_lea.hbm %s1358_s14, 256  ;;  %s1030_s22 = scalar_lea.hbm %s1526_s1, 512 }
  0x77   : > { %p1026_p4 = scmp.ne.s32.totalorder %s1358_s14, %s1025_s17  ;;  %p1031_p5 = scmp.lt.u32.totalorder %s1358_s14, %s1526_s1 }
  0x78   : > { %p1032_p7 = scmp.lt.u32.totalorder %s1030_s22, %s1025_s17  ;;  %p1034_p0 = scmp.lt.u32.totalorder %s1025_s17, %s1358_s14 }
  0x79   : > { %p1028_p9 = pnand %p1026_p4, %p997_p1 }
  0x7a   : > { %p1033_p12 = por %p1032_p7, %p1031_p5 }
  0x7b   : > { %p1029_p13 = pneg %p1028_p9 }
  0x7c   : > { %p1035_p2 = por %p1034_p0, %p1033_p12 }
  0x7e   : > { %p1036_p6 = pnand %p1035_p2, %p1029_p13 }
  0x80   : > { %1039 = shalt.err (!%p1036_p6)
}
  0x81   : > { %s1040_s8 = scalar_lea.vmem %s1393_s12, 256  ;;  %s1156_s30 = smov [#allocation5]  }
  0x82   : > { %p1041_p10 = scmp.ne.s32.totalorder %s1393_s12, %s1040_s8  ;;  %s1045_s29 = sshll.u32 %s1156_s30, 4  ;;  %s1046_s29 = int_to_ptr.vmem [resolvable:$false] %s1045_s29 }
  0x83   : > { %s1047_s0 = scalar_lea.vmem %s1046_s29, 512  ;;  %p1048_p9 = scmp.lt.s32.totalorder %s1393_s12, %s1046_s29 }
  0x84   : > { %p1043_p3 = pnand %p1041_p10, %p997_p1  ;;  %p1049_p5 = scmp.lt.s32.totalorder %s1047_s0, %s1040_s8 }
  0x86   : > { %p1044_p4 = pneg %p1043_p3  ;;  %p1050_p7 = por %p1049_p5, %p1048_p9 }
  0x88   : > { %p1051_p12 = pnand %p1050_p7, %p1044_p4 }
  0x8a   : > { %1054 = shalt.err (!%p1051_p12)
}
  0x8b   : > { %871 = dma.hbm_to_vmem [thread:$0]  (!%p1349_p11), %s1358_s14, 256, %s1393_s12, %s1395_s16, %s1557_s25, %s1557_s25, %s1556_s4  }
  0x8c   : > { %288 = sbr.rel (%p1243_p8) target bundleno = 748 (0x2ec), region = 40  ;;  %s1427_s13 = sand.u32 (!%p1243_p8), 1, %s1133_s19  }
  0x8d   : > { %s1430_s15 = sshll.u32 (!%p1243_p8), %s1427_s13, 4  ;;  %s291_s10 = scalar_lea.sflag (!%p1243_p8), [#allocation3], %s1427_s13 }
  0x8e   : > { %s294_s6 = scalar_lea.vmem (!%p1243_p8), [#allocation2], %s1430_s15  ;;  %p1558_p1 = scmp.ne.s32.totalorder (!%p1243_p8), %s1544_s26, 0 }
  0x93   : > { %1108 = dma.done.wait (%p1558_p1), %s291_s10, 256  }
  0x94   : > { %1110 = vsyncadd (%p1558_p1), %s291_s10, 4294967040  ;;  %s299_s28 = sand.u32 1, %s1224_s24   ;;  %s303_s4 = scalar_lea.vmem [#allocation5], %s1430_s15 }
  0x95   : > { %s300_s14 = scalar_lea.sflag [#allocation6], %s299_s28 }
  0x96   : > { %1112 = dma.done.wait (%p1558_p1), %s300_s14, 256  }
  0x97   : > { %1114 = vsyncadd (%p1558_p1), %s300_s14, 4294967040  ;;  %p1559_p8 = scmp.eq.s32.totalorder %s1224_s24, 0 }
  0x99   : > { %1116 = dma.done.wait (%p1559_p8), [#allocation6], 256   ;;  %p1560_p11 = pmov %p1559_p8 }
  0x9a   : > { %p1561_p13 = pmov %p1559_p8 }
  0x9b   : > { %1118 = vsyncadd (%p1560_p11), [#allocation6], 4294967040 }
  0x9c   : > { %1120 = dma.done.wait (%p1561_p13), [#allocation9], 1024   ;;  %p1562_p0 = pmov %p1559_p8 }
  0x9d   : > { %v357_v0 = vld [vmem:[%s303_s4] sm:$0xff]  ;;  %s1157_s25 = smov 32   ;;  %s1158_s12 = smov 16   ;;  %v358_v1 = vld [vmem:[%s303_s4 + $0x8] sm:$0xff]  ;;  %vm379_vm0 = vcmask 130048   ;;  %vm382_vm1 = vcmask 261120  }
  0x9e   : > { %1122 = vsyncadd (%p1562_p0), [#allocation9], 4294966272  ;;  %367 = vrot.lane.b32.xlu1 %v357_v0, %s1157_s25  ;;  %361 = vrot.lane.b32.xlu0 %v357_v0, %s1158_s12  ;;  %v403_v2 = vld [vmem:[#allocation7] sm:$0xff]  ;;  %s1159_s26 = smov 48   ;;  %v486_v3 = vld [vmem:[#allocation8] sm:$0xff]  ;;  %p349_p2 = scmp.lt.s32.totalorder %s1141_s21, 1 }
  0x9f   : > { %802 = vmatprep.mubr.msk.f32.mxu0 %vm379_vm0, %v403_v2  ;;  %v487_v4 = vld [vmem:[#allocation8 + $0x8] sm:$0xff]  ;;  %v488_v5 = vld [vmem:[#allocation8 + $0x10] sm:$0xff]  ;;  %v489_v7 = vld [vmem:[#allocation8 + $0x18] sm:$0xff]  ;;  %vm385_vm2 = vcmask 392192   ;;  %vm494_vm3 = vcmask 523264   ;;  %s783_s3 = sshll.u32 %s1141_s21, 8 }
  0xa0   : > { %v828_v6 = vpack.c.bf16 %v487_v4, %v486_v3  ;;  %v832_v8 = vpack.c.bf16 %v489_v7, %v488_v5  ;;  %v490_v9 = vld [vmem:[#allocation8 + $0x20] sm:$0xff]  ;;  %v491_v10 = vld [vmem:[#allocation8 + $0x28] sm:$0xff]  ;;  %v492_v12 = vld [vmem:[#allocation8 + $0x30] sm:$0xff]  ;;  %s350_s24 = scalar_select %p349_p2, %s1141_s21, 1 }
  0xa1   : > { %v836_v11 = vpack.c.bf16 %v491_v10, %v490_v9  ;;  %v493_v13 = vld [vmem:[#allocation8 + $0x38] sm:$0xff]  ;;  %v355_v27 = vld [vmem:[%s294_s6] sm:$0xff]  ;;  %s348_s11 = scalar_lea.vmem [#allocation10], %s1430_s15  ;;  %s1472_s29 = scalar_lea.hbm %s1530_s5, %s783_s3 }
  0xa2   : > { %369 = vrot.lane.b32.xlu1 %v358_v1, %s1157_s25  ;;  %363 = vrot.lane.b32.xlu0 %v358_v1, %s1158_s12  ;;  %v840_v14 = vpack.c.bf16 %v493_v13, %v492_v12  ;;  %s354_s17 = scalar_lea.vmem %s1527_s2, %s350_s24  ;;  %v356_v25 = vld [vmem:[%s294_s6 + $0x8] sm:$0xff]  ;;  %s608_s22 = sshll.u32 %s348_s11, 4  ;;  %s1474_s22 = int_to_ptr.vmem [resolvable:$true] %s608_s22 }
  0xa3   : > { %829 = vmatprep.subr.bf16.mxu1 %v828_v6  ;;  %v767_v29 = vld [vmem:[%s354_s17] ss:$0 sm:$0xff]  ;;  %v404_v39 = vld [vmem:[#allocation7 + $0x8] sm:$0xff]  ;;  %s593_s21 = scalar_lea.sflag [#allocation4], %s1427_s13  ;;  %s1055_s0 = scalar_lea.vmem %s1474_s22, 256 }
  0xa4   : > { %831 = vmatpush3.bf16.msra.mxu1 %v828_v6  ;;  %p1056_p6 = scmp.ne.s32.totalorder %s1474_s22, %s1055_s0  ;;  %p1563_p10 = scmp.ne.s32.totalorder %s1552_s9, 0 }
  0xa5   : > { %833 = vmatprep.subr.bf16.mxu1 %v832_v8  ;;  %s1160_s15 = smov [#allocation10]  }
  0xa6   : > { %375 = vrot.lane.b32.xlu1 %v358_v1, %s1159_s26  ;;  %373 = vrot.lane.b32.xlu0 %v357_v0, %s1159_s26  ;;  %p1057_p3 = pnand %p1056_p6, %p1563_p10  ;;  %s1059_s10 = sshll.u32 %s1160_s15, 4  ;;  %s1060_s10 = int_to_ptr.vmem [resolvable:$false] %s1059_s10 }
  0xa7   : > { %s1061_s6 = scalar_lea.vmem %s1060_s10, 512  ;;  %p1062_p9 = scmp.lt.s32.totalorder %s1474_s22, %s1060_s10 }
  0xa8   : > { %835 = vmatpush3.bf16.msra.mxu1 %v832_v8  ;;  %p1058_p4 = pneg %p1057_p3  ;;  %p1063_p5 = scmp.lt.s32.totalorder %s1061_s6, %s1055_s0 }
  0xa9   : > { %837 = vmatprep.subr.bf16.mxu1 %v836_v11 }
  0xaa   : > { %p1064_p7 = por %p1063_p5, %p1062_p9 }
  0xac   : > { %839 = vmatpush3.bf16.msra.mxu1 %v836_v11  ;;  %p1065_p12 = pnand %p1064_p7, %p1058_p4 }
  0xad   : > { %841 = vmatprep.subr.bf16.mxu1 %v840_v14 }
  0xb0   : > { %843 = vmatpush3.bf16.msra.mxu1 %v840_v14 }
 0x110   : > { %v368_v15 = vpop.permute.xlu1 %367  ;;  %v362_v16 = vpop.permute.xlu0 %361 }
 0x111   : > { %v380_v19 = vsel %vm379_vm0, %v357_v0, %v362_v16 }
 0x112   : > { %v383_v23 = vsel %vm382_vm1, %v380_v19, %v368_v15 }
 0x114   : > { %v370_v17 = vpop.permute.xlu1 %369  ;;  %v364_v18 = vpop.permute.xlu0 %363 }
 0x115   : > { %v381_v20 = vsel %vm379_vm0, %v358_v1, %v364_v18 }
 0x116   : > { %v384_v22 = vsel %vm382_vm1, %v381_v20, %v370_v17 }
 0x118   : > { %v376_v21 = vpop.permute.xlu1 %375  ;;  %v374_v24 = vpop.permute.xlu0 %373 }
 0x119   : > { %v387_v26 = vsel %vm385_vm2, %v384_v22, %v376_v21  ;;  %v386_v28 = vsel %vm385_vm2, %v383_v23, %v374_v24 }
 0x11a   : > { %v392_v30 = vsub.f32 1.0, %v387_v26  ;;  %v391_v31 = vsub.f32 1.0, %v386_v28  ;;  %v390_v32 = vmul.f32 %v387_v26, %v356_v25  ;;  %v389_v33 = vmul.f32 %v386_v28, %v355_v27 }
 0x11c   : > { %v399_v34 = vmul.f32 %v767_v29, %v391_v31  ;;  %v400_v35 = vmul.f32 %v767_v29, %v392_v30 }
 0x11e   : > { %v401_v36 = vadd.f32 %v399_v34, %v389_v33  ;;  %v402_v37 = vadd.f32 %v400_v35, %v390_v32 }
 0x120   : > { %v824_v38 = vpack.c.bf16 %v402_v37, %v401_v36 }
 0x122   : > { %825 = vmatprep.subr.bf16.mxu0 %v824_v38 }
 0x123   : > { %827 = vmatpush3.bf16.msra.mxu0 %v824_v38 }
 0x126   : > { %803 = vmatmul.mubr.msk.f32.vlgmr.msra.gmra.mrb[0].mxu0 %vm379_vm0, %v404_v39 }
 0x1f9   : > { %v804_v40 = vpop.f32.mrb[0].mxu0 }
 0x1fa   : > { %v477_v41 = vpop.f32.mrb[1].mxu0 }
 0x1fb   : > { %821 = vmatprep.mubr.msk.f32.mxu1 %vm494_vm3, %v477_v41 }
 0x1fc   : > { %822 = vmatmul.mubr.msk.f32.vlgmr.msra.gmra.mrb[0].mxu1 %vm494_vm3, %v804_v40 }
 0x2cf   : > { %v823_v42 = vpop.f32.mrb[0].mxu1 }
 0x2d0   : > { %v577_v43 = vsub.f32 %v402_v37, %v823_v42  ;;  %v567_v44 = vpop.f32.mrb[1].mxu1 }
 0x2d1   : > { %v576_v45 = vsub.f32 %v401_v36, %v567_v44 }
 0x2d2   : > { %v579_v46 = vmul.f32 4.0, %v577_v43 }
 0x2d3   : > { %v578_v47 = vmul.f32 4.0, %v576_v45 }
 0x2d4   : > { %v773_v48 = vclamps-f32 %v579_v46, 1.0 }
 0x2d5   : > { %v772_v49 = vclamps-f32 %v578_v47, 1.0 }
 0x2d6   : > { %v585_v50 = vadd.f32 1.0, %v773_v48 }
 0x2d7   : > { %v584_v51 = vadd.f32 1.0, %v772_v49 }
 0x2d8   : > { %v587_v52 = vmul.f32 %v585_v50, %v387_v26 }
 0x2d9   : > { %v586_v53 = vmul.f32 %v584_v51, %v386_v28 }
 0x2da   : > { %v775_v54 = vadd.f32 -1.0, %v587_v52 }
 0x2db   : > { %v774_v55 = vadd.f32 -1.0, %v586_v53 }
 0x2dc   : > { %591 = vst.msk [vmem:[%s348_s11 + $0x8] sm:$0xff] %vm494_vm3, %v775_v54 }
 0x2dd   : > { %590 = vst.msk [vmem:[%s348_s11] sm:$0xff] %vm494_vm3, %v774_v55 }
 0x2de   : > { %1068 = shalt.err (!%p1065_p12)
}
 0x2df   : > { %s1069_s28 = scalar_lea.hbm %s1472_s29, 256  ;;  %s1073_s25 = scalar_lea.hbm %s1530_s5, 512 }
 0x2e0   : > { %p1070_p1 = scmp.ne.s32.totalorder %s1472_s29, %s1069_s28  ;;  %p1074_p13 = scmp.lt.u32.totalorder %s1472_s29, %s1530_s5 }
 0x2e1   : > { %p1075_p0 = scmp.lt.u32.totalorder %s1073_s25, %s1069_s28  ;;  %p1077_p6 = scmp.lt.u32.totalorder %s1069_s28, %s1472_s29 }
 0x2e2   : > { %p1071_p8 = pnand %p1070_p1, %p1563_p10 }
 0x2e3   : > { %p1076_p2 = por %p1075_p0, %p1074_p13 }
 0x2e4   : > { %p1072_p11 = pneg %p1071_p8 }
 0x2e5   : > { %p1078_p3 = por %p1077_p6, %p1076_p2 }
 0x2e7   : > { %p1079_p4 = pnand %p1078_p3, %p1072_p11 }
 0x2e9   : > { %1082 = shalt.err (!%p1079_p4)
}
 0x2ea   : > { %s1161_s24 = smov 128   ;;  %s1162_s7 = smov 8  }
 0x2eb   : > { %856 = dma.vmem_to_hbm [thread:$0]  (%p1563_p10), %s1474_s22, 256, %s1472_s29, %s593_s21, %s1161_s24, %s1161_s24, %s1162_s7  }
 0x2ec PF: > { %s623_s16 = sand.u32 1, %s1129_s18   ;;  %p1564_p9 = scmp.ne.s32.totalorder %s1545_s27, 0 }
 0x2ed   : > { %p1565_p5 = scmp.ge.s32.totalorder %s1149_s23, 2  ;;  %s624_s17 = scalar_lea.sflag [#allocation4], %s623_s16 }
 0x2ef   : > { %p873_p7 = pnand %p1565_p5, %p1564_p9 }
 0x2f1   : > { %1124 = dma.done.wait (!%p873_p7), %s624_s17, 256  }
 0x2f2   : > { %1126 = vsyncadd (!%p873_p7), %s624_s17, 4294967040  ;;  %s25_s23 = sadd.s32 1, %s1149_s23   ;;  %s1566_s3 = sld [smem:[#allocation18_spill]] }
 0x2f3   : > { %p22_p12 = scmp.ge.s32.totalorder %s25_s23, 4   ;;  %s1567_s21 = sld [smem:[#allocation16_spill]] }
 0x2f4   : > { %s1568_s22 = sld [smem:[#allocation17_spill]]  ;;  %s1569_s18 = smov %s1133_s19 }
 0x2f5   : > { %s1570_s19 = smov %s1137_s20  ;;  %24 = sbr.rel (!%p22_p12) target bundleno = 13 (0xd), region = 109 }
 0x2f8   : > { %s1571_s20 = smov %s1566_s3 }
 0x2fc   :  { %629 = vsyncpa [#allocation3], 1 }
 0x2fd   :  { %631 = vsyncpa [#allocation3 + $0x1], 1 }
 0x2fe   :  { %632 = vsyncpa [#allocation6], 1 }
 0x2ff   :  { %634 = vsyncpa [#allocation6 + $0x1], 1 }
 0x300   :  { %635 = vsyncpa [#allocation9], 1 }
 0x301   :  { %636 = vsyncpa [#allocation4], 1 }
 0x302   :  { %638 = vsyncpa [#allocation4 + $0x1], 1 }

</bundles_post_ra>
